<compile_context>
chip_gen: v6e
topology: v6e:2x2x1
jax: 0.10.0
libtpu: 0.0.40
codegen_flags: <defaults>
</compile_context>

<pallas_src>
import functools

import jax
import jax.numpy as jnp
from jax.experimental import pallas as pl
from jax.experimental.pallas import tpu as pltpu


def critic_kernel(x_ref, w1_ref, b1_ref, w2_ref, b2_ref, w3_ref, b3_ref, o_ref):
    """One batch tile, feature-major shapes:
       x:(n_obs,T)  w1:(H,n_obs) b1:(H,1)  w2:(H,H) b2:(H,1)  w3:(1,H) b3:(1,1)
       o:(1,T)  (biases are f32; weights/x may be bf16)."""
    mm_dtype = w2_ref.dtype
    n_obs = x_ref.shape[0]

    # ---- fc1 ----
    if n_obs <= 16:
        # Tiny contraction dim: n_obs VPU broadcast FMAs in f32 instead of an
        # MXU pass that pads K up to 128.
        x = x_ref[...].astype(jnp.float32)      # (n_obs, T)
        w1 = w1_ref[...].astype(jnp.float32)    # (H, n_obs)
        acc = w1[:, 0:1] * x[0:1, :]
        for k in range(1, n_obs):
            acc = acc + w1[:, k:k + 1] * x[k:k + 1, :]
    else:
        acc = jnp.dot(w1_ref[...], x_ref[...], preferred_element_type=jnp.float32)
    h1 = jnp.maximum(acc + b1_ref[...], 0.0)    # (H, T) f32

    # ---- fc2: MXU matmul, bf16 operands / f32 accumulation ----
    h2 = jnp.dot(w2_ref[...], h1.astype(mm_dtype),
                 preferred_element_type=jnp.float32)
    h2 = jnp.maximum(h2 + b2_ref[...], 0.0)     # (H, T) f32

    # ---- out: (1,H) @ (H,T) -> (1,T) lane-dense row ----
    o = jnp.dot(w3_ref[...], h2.astype(mm_dtype),
                preferred_element_type=jnp.float32)
    o_ref[...] = (o + b3_ref[...]).astype(o_ref.dtype)


@functools.partial(jax.jit, static_argnames=("tile_b", "matmul_dtype"))
def critic_forward(x, params, *, tile_b=512, matmul_dtype=jnp.bfloat16):
    """x: (B, n_obs) f32 -> (B, 1) f32.  Weights (out,in), biases (out,1), f32."""
    w1, b1, w2, b2, w3, b3 = params
    B, n_obs = x.shape

    tile_b = max(128, int(tile_b))
    assert tile_b % 128 == 0, "tile_b must be a multiple of 128 lanes"
    b_pad = pl.cdiv(B, tile_b) * tile_b
    grid = (b_pad // tile_b,)

    # Feature-major, zero-padded, lane-dense batch; matmul operands in bf16.
    x_t = jnp.zeros((n_obs, b_pad), matmul_dtype).at[:, :B].set(
        x.T.astype(matmul_dtype))
    w1c, w2c, w3c = (w.astype(matmul_dtype) for w in (w1, w2, w3))

    # Constant index_map -> block stays VMEM-resident across grid steps.
    resident = lambda a: pl.BlockSpec(a.shape, lambda i: (0, 0))

    out = pl.pallas_call(
        critic_kernel,
        out_shape=jax.ShapeDtypeStruct((1, b_pad), jnp.float32),
        grid=grid,
        in_specs=[
            pl.BlockSpec((n_obs, tile_b), lambda i: (0, i)),   # x batch tile
            resident(w1c), resident(b1),
            resident(w2c), resident(b2),
            resident(w3c), resident(b3),
        ],
        out_specs=pl.BlockSpec((1, tile_b), lambda i: (0, i)),  # lane-dense row
        compiler_params=pltpu.CompilerParams(
            dimension_semantics=("parallel",)),                 # megacore on v7x
    )(x_t, w1c, b1, w2c, b2, w3c, b3)

    return out[0, :B].reshape(B, 1)


def init_critic_params(key, n_observations, hidden=64):
    """PyTorch-style uniform(+-1/sqrt(fan_in)) init.
    Weights stored (out, in) like nn.Linear; biases stored as (out, 1) columns."""
    ks = jax.random.split(key, 6)

    def lin(kw, kb, fan_in, fan_out):
        bound = 1.0 / jnp.sqrt(jnp.float32(fan_in))
        w = jax.random.uniform(kw, (fan_out, fan_in), jnp.float32, -bound, bound)
        b = jax.random.uniform(kb, (fan_out, 1), jnp.float32, -bound, bound)
        return w, b

    w1, b1 = lin(ks[0], ks[1], n_observations, hidden)
    w2, b2 = lin(ks[2], ks[3], hidden, hidden)
    w3, b3 = lin(ks[4], ks[5], hidden, 1)
    return (w1, b1, w2, b2, w3, b3)


def critic_reference(x, params):
    """Pure-JAX f32 reference with PyTorch row-major semantics."""
    w1, b1, w2, b2, w3, b3 = params
    h1 = jnp.maximum(x @ w1.T + b1.T, 0.0)
    h2 = jnp.maximum(h1 @ w2.T + b2.T, 0.0)
    return h2 @ w3.T + b3.T


if __name__ == "__main__":
    n_observations = 3   # Pendulum-v1 observation dim
    batch = 8            # small rollout-style batch for the test

    key = jax.random.PRNGKey(0)
    kx, kp = jax.random.split(key)
    x = jax.random.normal(kx, (batch, n_observations), jnp.float32)
    params = init_critic_params(kp, n_observations)

    ref = critic_reference(x, params)

    # 1) Exact-semantics check: full f32 path, tight tolerance.
    out_f32 = jax.block_until_ready(
        critic_forward(x, params, tile_b=128, matmul_dtype=jnp.float32))
    assert out_f32.shape == (batch, 1), out_f32.shape
    assert jnp.allclose(out_f32, ref, atol=1e-5, rtol=1e-5), (out_f32, ref)

    # 2) Performance path: bf16 matmul operands + f32 accumulation (looser tol
    #    per bf16 input rounding).
    out_bf16 = jax.block_until_ready(
        critic_forward(x, params, tile_b=128, matmul_dtype=jnp.bfloat16))
    assert out_bf16.shape == (batch, 1), out_bf16.shape
    assert jnp.allclose(out_bf16, ref, atol=5e-2, rtol=5e-2), (out_bf16, ref)

    print("KERNEL_OK")
</pallas_src>

<mosaic_0001>
module attributes {stable_mosaic.version = 11 : i64} {
  func.func @critic_kernel(%arg0: i32, %arg1: memref<3x128xf32, #tpu.memory_space<vmem>>, %arg2: memref<64x3xf32, #tpu.memory_space<vmem>>, %arg3: memref<64x1xf32, #tpu.memory_space<vmem>>, %arg4: memref<64x64xf32, #tpu.memory_space<vmem>>, %arg5: memref<64x1xf32, #tpu.memory_space<vmem>>, %arg6: memref<1x64xf32, #tpu.memory_space<vmem>>, %arg7: memref<1x1xf32, #tpu.memory_space<vmem>>, %arg8: memref<1x128xf32, #tpu.memory_space<vmem>>) attributes {dimension_semantics = [#tpu.dimension_semantics<parallel>], iteration_bounds = array<i64: 1>, scalar_prefetch = 0 : i64, scratch_operands = 0 : i64, tpu.core_type = #tpu.core_type<tc>, window_params = [{transform_indices = @transform_0, window_bounds = array<i64: 3, 128>}, {pipeline_mode = #tpu.pipeline_mode<synchronous>, transform_indices = @transform_1, window_bounds = array<i64: 64, 3>}, {pipeline_mode = #tpu.pipeline_mode<synchronous>, transform_indices = @transform_2, window_bounds = array<i64: 64, 1>}, {pipeline_mode = #tpu.pipeline_mode<synchronous>, transform_indices = @transform_3, window_bounds = array<i64: 64, 64>}, {pipeline_mode = #tpu.pipeline_mode<synchronous>, transform_indices = @transform_4, window_bounds = array<i64: 64, 1>}, {pipeline_mode = #tpu.pipeline_mode<synchronous>, transform_indices = @transform_5, window_bounds = array<i64: 1, 64>}, {pipeline_mode = #tpu.pipeline_mode<synchronous>, transform_indices = @transform_6, window_bounds = array<i64: 1, 1>}, {transform_indices = @transform_7, window_bounds = array<i64: 1, 128>}]} {
    %c0 = arith.constant 0 : index
    %c0_0 = arith.constant 0 : index
    %0 = vector.load %arg1[%c0, %c0_0] : memref<3x128xf32, #tpu.memory_space<vmem>>, vector<3x128xf32>
    %c0_1 = arith.constant 0 : index
    %c0_2 = arith.constant 0 : index
    %1 = vector.load %arg2[%c0_1, %c0_2] : memref<64x3xf32, #tpu.memory_space<vmem>>, vector<64x3xf32>
    %2 = vector.extract_strided_slice %1 {offsets = [0, 0], sizes = [64, 1], strides = [1, 1]} : vector<64x3xf32> to vector<64x1xf32>
    %3 = vector.extract_strided_slice %0 {offsets = [0, 0], sizes = [1, 128], strides = [1, 1]} : vector<3x128xf32> to vector<1x128xf32>
    %4 = vector.broadcast %2 : vector<64x1xf32> to vector<64x128xf32>
    %5 = vector.broadcast %3 : vector<1x128xf32> to vector<64x128xf32>
    %6 = arith.mulf %4, %5 : vector<64x128xf32>
    %7 = vector.extract_strided_slice %1 {offsets = [0, 1], sizes = [64, 1], strides = [1, 1]} : vector<64x3xf32> to vector<64x1xf32>
    %8 = vector.extract_strided_slice %0 {offsets = [1, 0], sizes = [1, 128], strides = [1, 1]} : vector<3x128xf32> to vector<1x128xf32>
    %9 = vector.broadcast %7 : vector<64x1xf32> to vector<64x128xf32>
    %10 = vector.broadcast %8 : vector<1x128xf32> to vector<64x128xf32>
    %11 = arith.mulf %9, %10 : vector<64x128xf32>
    %12 = arith.addf %6, %11 : vector<64x128xf32>
    %13 = vector.extract_strided_slice %1 {offsets = [0, 2], sizes = [64, 1], strides = [1, 1]} : vector<64x3xf32> to vector<64x1xf32>
    %14 = vector.extract_strided_slice %0 {offsets = [2, 0], sizes = [1, 128], strides = [1, 1]} : vector<3x128xf32> to vector<1x128xf32>
    %15 = vector.broadcast %13 : vector<64x1xf32> to vector<64x128xf32>
    %16 = vector.broadcast %14 : vector<1x128xf32> to vector<64x128xf32>
    %17 = arith.mulf %15, %16 : vector<64x128xf32>
    %18 = arith.addf %12, %17 : vector<64x128xf32>
    %c0_3 = arith.constant 0 : index
    %c0_4 = arith.constant 0 : index
    %19 = vector.load %arg3[%c0_3, %c0_4] : memref<64x1xf32, #tpu.memory_space<vmem>>, vector<64x1xf32>
    %20 = vector.broadcast %19 : vector<64x1xf32> to vector<64x128xf32>
    %21 = arith.addf %18, %20 : vector<64x128xf32>
    %cst = arith.constant 0.000000e+00 : f32
    %22 = vector.broadcast %cst : f32 to vector<64x128xf32>
    %23 = arith.maximumf %21, %22 : vector<64x128xf32>
    %c0_5 = arith.constant 0 : index
    %c0_6 = arith.constant 0 : index
    %24 = vector.load %arg4[%c0_5, %c0_6] : memref<64x64xf32, #tpu.memory_space<vmem>>, vector<64x64xf32>
    %cst_7 = arith.constant dense<0.000000e+00> : vector<64x128xf32>
    %25 = tpu.matmul %24, %23, %cst_7 {dimension_numbers = #tpu.dot_dimension_numbers<[1], [0], [0], [1], [0, 0, 1, 1], [], []>} : vector<64x64xf32>, vector<64x128xf32>, vector<64x128xf32> -> vector<64x128xf32>
    %c0_8 = arith.constant 0 : index
    %c0_9 = arith.constant 0 : index
    %26 = vector.load %arg5[%c0_8, %c0_9] : memref<64x1xf32, #tpu.memory_space<vmem>>, vector<64x1xf32>
    %27 = vector.broadcast %26 : vector<64x1xf32> to vector<64x128xf32>
    %28 = arith.addf %25, %27 : vector<64x128xf32>
    %cst_10 = arith.constant 0.000000e+00 : f32
    %29 = vector.broadcast %cst_10 : f32 to vector<64x128xf32>
    %30 = arith.maximumf %28, %29 : vector<64x128xf32>
    %c0_11 = arith.constant 0 : index
    %c0_12 = arith.constant 0 : index
    %31 = vector.load %arg6[%c0_11, %c0_12] : memref<1x64xf32, #tpu.memory_space<vmem>>, vector<1x64xf32>
    %cst_13 = arith.constant dense<0.000000e+00> : vector<1x128xf32>
    %32 = tpu.matmul %31, %30, %cst_13 {dimension_numbers = #tpu.dot_dimension_numbers<[1], [0], [0], [1], [0, 0, 1, 1], [], []>} : vector<1x64xf32>, vector<64x128xf32>, vector<1x128xf32> -> vector<1x128xf32>
    %c0_14 = arith.constant 0 : index
    %c0_15 = arith.constant 0 : index
    %33 = vector.load %arg7[%c0_14, %c0_15] : memref<1x1xf32, #tpu.memory_space<vmem>>, vector<1x1xf32>
    %34 = vector.broadcast %33 : vector<1x1xf32> to vector<1x128xf32>
    %35 = arith.addf %32, %34 : vector<1x128xf32>
    %c0_16 = arith.constant 0 : index
    %c0_17 = arith.constant 0 : index
    %36 = vector.load %arg8[%c0_16, %c0_17] : memref<1x128xf32, #tpu.memory_space<vmem>>, vector<1x128xf32>
    tpu.vector_store %arg8[%c0_16, %c0_17], %35 {strides = array<i32>} : memref<1x128xf32, #tpu.memory_space<vmem>>, vector<1x128xf32>,
    return
  }
  func.func @transform_0(%arg0: i32) -> (i32, i32) {
    %c0_i32 = arith.constant 0 : i32
    %c0_i32_0 = arith.constant 0 : i32
    return %c0_i32, %arg0 : i32, i32
  }
  func.func @transform_1(%arg0: i32) -> (i32, i32) {
    %c0_i32 = arith.constant 0 : i32
    %c0_i32_0 = arith.constant 0 : i32
    %c0_i32_1 = arith.constant 0 : i32
    return %c0_i32, %c0_i32_0 : i32, i32
  }
  func.func @transform_2(%arg0: i32) -> (i32, i32) {
    %c0_i32 = arith.constant 0 : i32
    %c0_i32_0 = arith.constant 0 : i32
    %c0_i32_1 = arith.constant 0 : i32
    return %c0_i32, %c0_i32_0 : i32, i32
  }
  func.func @transform_3(%arg0: i32) -> (i32, i32) {
    %c0_i32 = arith.constant 0 : i32
    %c0_i32_0 = arith.constant 0 : i32
    %c0_i32_1 = arith.constant 0 : i32
    return %c0_i32, %c0_i32_0 : i32, i32
  }
  func.func @transform_4(%arg0: i32) -> (i32, i32) {
    %c0_i32 = arith.constant 0 : i32
    %c0_i32_0 = arith.constant 0 : i32
    %c0_i32_1 = arith.constant 0 : i32
    return %c0_i32, %c0_i32_0 : i32, i32
  }
  func.func @transform_5(%arg0: i32) -> (i32, i32) {
    %c0_i32 = arith.constant 0 : i32
    %c0_i32_0 = arith.constant 0 : i32
    %c0_i32_1 = arith.constant 0 : i32
    return %c0_i32, %c0_i32_0 : i32, i32
  }
  func.func @transform_6(%arg0: i32) -> (i32, i32) {
    %c0_i32 = arith.constant 0 : i32
    %c0_i32_0 = arith.constant 0 : i32
    %c0_i32_1 = arith.constant 0 : i32
    return %c0_i32, %c0_i32_0 : i32, i32
  }
  func.func @transform_7(%arg0: i32) -> (i32, i32) {
    %c0_i32 = arith.constant 0 : i32
    %c0_i32_0 = arith.constant 0 : i32
    return %c0_i32, %arg0 : i32, i32
  }
}

</mosaic_0001>

<bundles_post_ra>
// kernel: critic_forward.1
= control target key start
LH: loop header
LB: loop body
LE: loop exit
PB: predicated region body
PF: predicated region fallthrough
CT: control target
= control target key end

     0   :  { %v646_v0 = vmov 2   ;;  %v647_v1 = vmov 0   ;;  %v648_v6 = vmov 1   ;;  %vm313_vm0 = vcmask 523264   ;;  %s870_s1 = inlined_call_operand.vmem [shape: f32[64,3], index: 1, kind: input, shape index: {}]   ;;  %s871_s6 = inlined_call_operand.<no memory space> [shape: f32[1,1], index: 6, kind: input, shape index: {}]   ;;  %s872_s2 = inlined_call_operand.vmem [shape: f32[64,1], index: 2, kind: input, shape index: {}]   ;;  %s873_s4 = inlined_call_operand.vmem [shape: f32[64,1], index: 4, kind: input, shape index: {}]   ;;  %s874_s3 = inlined_call_operand.vmem [shape: f32[64,64], index: 3, kind: input, shape index: {}]   ;;  %s875_s0 = inlined_call_operand.vmem [shape: f32[3,128], index: 0, kind: input, shape index: {}]   ;;  %s876_s5 = inlined_call_operand.vmem [shape: f32[1,64], index: 5, kind: input, shape index: {}]   ;;  %s877_s7 = inlined_call_operand.vmem [shape: f32[1,128], index: 7, kind: output, shape index: {}]  }
   0x1   :  { %632 = vset.pattern.permute.xlu0 %v646_v0  ;;  %626 = vset.pattern.permute.xlu1 %v647_v1  ;;  %v35_v2 = vld [vmem:[%s870_s1 + $0x30] sm:$0xff]  ;;  %v34_v3 = vld [vmem:[%s870_s1 + $0x28] sm:$0xff]  ;;  %v12_v4 = vstv %s871_s6  ;;  %v36_v5 = vld [vmem:[%s870_s1 + $0x38] sm:$0xff]  ;;  %v77_v34 = vlaneseq  ;;  %vm650_vm1 = vmmov 0  }
   0x2   :  { %69 = vperm.xlu1 %626, %v35_v2   ;;  %162 = vperm.xlu0 %632, %v34_v3   ;;  %13 = vst [vmem:[#allocation2] sm:$0x1] %v12_v4  ;;  %v32_v7 = vld [vmem:[%s870_s1 + $0x18] sm:$0xff]  ;;  %v30_v8 = vld [vmem:[%s870_s1 + $0x8] sm:$0xff]  ;;  %v33_v9 = vld [vmem:[%s870_s1 + $0x20] sm:$0xff] }
   0x3   :  { %v200_v10 = vld [vmem:[%s872_s2 + $0x38] sm:$0xff]  ;;  %v31_v11 = vld [vmem:[%s870_s1 + $0x10] sm:$0xff]  ;;  %v198_v12 = vld [vmem:[%s872_s2 + $0x28] sm:$0xff]  ;;  %v790_v37 = vshrl.u32 %v77_v34, 7 }
   0x4   :  { %v29_v13 = vld [vmem:[%s870_s1] sm:$0xff]  ;;  %v196_v14 = vld [vmem:[%s872_s2 + $0x18] sm:$0xff]  ;;  %v199_v15 = vld [vmem:[%s872_s2 + $0x30] sm:$0xff] }
   0x5   :  { %v195_v16 = vld [vmem:[%s872_s2 + $0x10] sm:$0xff]  ;;  %v193_v17 = vld [vmem:[%s872_s2] sm:$0xff]  ;;  %v194_v23 = vld [vmem:[%s872_s2 + $0x8] sm:$0xff]  ;;  %v79_v39 = vsub.s32 0, %v790_v37  ;;  %v123_v40 = vsub.s32 1, %v790_v37  ;;  %v175_v45 = vsub.s32 2, %v790_v37 }
   0x6   :  { %627 = vset.pattern.permute.xlu1 %v648_v6  ;;  %633 = vset.pattern.permute.xlu0 %v648_v6  ;;  %v271_v18 = vld [vmem:[%s873_s4 + $0x30] sm:$0xff]  ;;  %v269_v19 = vld [vmem:[%s873_s4 + $0x20] sm:$0xff]  ;;  %v272_v24 = vld [vmem:[%s873_s4 + $0x38] sm:$0xff] }
   0x7   :  { %114 = vperm.xlu1 %627, %v35_v2   ;;  %118 = vperm.xlu0 %633, %v36_v5   ;;  %v267_v20 = vld [vmem:[%s873_s4 + $0x10] sm:$0xff]  ;;  %v265_v21 = vld [vmem:[%s873_s4] sm:$0xff]  ;;  %v270_v26 = vld [vmem:[%s873_s4 + $0x28] sm:$0xff] }
   0x8   :  { %v197_v22 = vld [vmem:[%s872_s2 + $0x20] sm:$0xff]  ;;  %v268_v27 = vld [vmem:[%s873_s4 + $0x18] sm:$0xff]  ;;  %v266_v28 = vld [vmem:[%s873_s4 + $0x8] sm:$0xff] }
   0x9   :  { %v257_v25 = vld [vmem:[%s874_s3] sm:$0xff] }
   0xa   :  { %590 = vmatprep.mubr.msk.f32.mxu0 %vm313_vm0, %v257_v25  ;;  %v452_v29 = vld [vmem:[#allocation2] sm:$0x1] }
   0xb   :  { %628 = vset.pattern.permute.xlu1 %v646_v0  ;;  %102 = vperm.xlu0 %633, %v32_v7   ;;  %v28_v42 = vld [vmem:[%s875_s0] sm:$0x7] }
   0xc   :  { %170 = vperm.xlu1 %628, %v36_v5   ;;  %v801_v44 = vrot.slane %v28_v42, %v79_v39  ;;  %v804_v46 = vrot.slane %v28_v42, %v123_v40  ;;  %v808_v50 = vrot.slane %v28_v42, %v175_v45 }
   0xf   :  { %94 = vperm.xlu0 %633, %v30_v8  }
  0x10   :  { %629 = vset.pattern.permute.xlu1 %v648_v6 }
  0x11   :  { %110 = vperm.xlu1 %629, %v34_v3  }
  0x13   :  { %640 = vset.pattern.permute.xlu0 %v647_v1 }
  0x14   :  { %74 = vperm.xlu0 %640, %v36_v5  }
  0x15   :  { %630 = vset.pattern.permute.xlu1 %v646_v0 }
  0x16   :  { %166 = vperm.xlu1 %630, %v35_v2  }
  0x18   :  { %64 = vperm.xlu0 %640, %v34_v3  }
  0x1a   :  { %631 = vset.pattern.permute.xlu1 %v648_v6 }
  0x1b   :  { %106 = vperm.xlu1 %631, %v33_v9  }
  0x1c   :  { %59 = vperm.xlu0 %640, %v33_v9  }
  0x1f   :  { %634 = vset.pattern.permute.xlu1 %v647_v1 }
  0x20   :  { %238 = vperm.xlu1 %634, %v200_v10   ;;  %49 = vperm.xlu0 %640, %v31_v11  }
  0x24   :  { %54 = vperm.xlu1 %634, %v32_v7   ;;  %228 = vperm.xlu0 %640, %v198_v12  }
  0x28   :  { %635 = vset.pattern.permute.xlu1 %v646_v0  ;;  %39 = vperm.xlu0 %640, %v29_v13  }
  0x29   :  { %158 = vperm.xlu1 %635, %v33_v9  }
  0x2c   :  { %218 = vperm.xlu0 %640, %v196_v14  }
  0x2d   :  { %636 = vset.pattern.permute.xlu1 %v647_v1 }
  0x2e   :  { %233 = vperm.xlu1 %636, %v199_v15  }
  0x30   :  { %213 = vperm.xlu0 %640, %v195_v16  }
  0x32   :  { %637 = vset.pattern.permute.xlu1 %v648_v6 }
  0x33   :  { %98 = vperm.xlu1 %637, %v31_v11  }
  0x34   :  { %203 = vperm.xlu0 %640, %v193_v17  }
  0x37   :  { %638 = vset.pattern.permute.xlu1 %v646_v0 }
  0x38   :  { %154 = vperm.xlu1 %638, %v32_v7   ;;  %305 = vperm.xlu0 %640, %v271_v18  }
  0x3c   :  { %639 = vset.pattern.permute.xlu1 %v647_v1  ;;  %295 = vperm.xlu0 %640, %v269_v19  }
  0x3d   :  { %44 = vperm.xlu1 %639, %v30_v8  }
  0x40   :  { %285 = vperm.xlu0 %640, %v267_v20  }
  0x41   :  { %641 = vset.pattern.permute.xlu1 %v646_v0 }
  0x42   :  { %150 = vperm.xlu1 %641, %v31_v11  }
  0x44   :  { %275 = vperm.xlu0 %640, %v265_v21  }
  0x46   :  { %642 = vset.pattern.permute.xlu1 %v647_v1 }
  0x47   :  { %223 = vperm.xlu1 %642, %v197_v22  }
  0x4b   :  { %643 = vset.pattern.permute.xlu1 %v648_v6 }
  0x4c   :  { %90 = vperm.xlu1 %643, %v29_v13  }
  0x50   :  { %644 = vset.pattern.permute.xlu1 %v646_v0 }
  0x51   :  { %146 = vperm.xlu1 %644, %v30_v8  }
  0x55   :  { %142 = vperm.xlu1 %644, %v29_v13  }
  0x59   :  { %645 = vset.pattern.permute.xlu1 %v647_v1 }
  0x5a   :  { %208 = vperm.xlu1 %645, %v194_v23  }
  0x5e   :  { %310 = vperm.xlu1 %645, %v272_v24  }
  0x62   :  { %300 = vperm.xlu1 %645, %v270_v26  }
  0x66   :  { %290 = vperm.xlu1 %645, %v268_v27  }
  0x6a   :  { %280 = vperm.xlu1 %645, %v266_v28  }
  0x6e   :  { %455 = vperm.xlu1 %645, %v452_v29  }
  0x7d   :  { %v70_v30 = vpop.permute.xlu1 %69  ;;  %v163_v31 = vpop.permute.xlu0 %162 }
  0x7e   :  { %v87_v1 = vmul.f32 %v801_v44, %v70_v30  ;;  %v182_v2 = vmul.f32 %v808_v50, %v163_v31 }
  0x82   :  { %v115_v32 = vpop.permute.xlu1 %114  ;;  %v119_v33 = vpop.permute.xlu0 %118 }
  0x83   :  { %v132_v48 = vmul.f32 %v804_v46, %v119_v33  ;;  %v131_v63 = vmul.f32 %v804_v46, %v115_v32 }
  0x85   :  { %v139_v6 = vadd.f32 %v131_v63, %v87_v1 }
  0x86   :  { %v103_v35 = vpop.permute.xlu0 %102 }
  0x87   :  { %v171_v36 = vpop.permute.xlu1 %170  ;;  %v128_v19 = vmul.f32 %v804_v46, %v103_v35 }
  0x88   :  { %v184_v54 = vmul.f32 %v808_v50, %v171_v36 }
  0x8a   :  { %v792_v38 = vpop.permute.xlu0 %94 }
  0x8c   :  { %v111_v41 = vpop.permute.xlu1 %110 }
  0x8d   :  { %v130_v0 = vmul.f32 %v804_v46, %v111_v41 }
  0x8f   :  { %v75_v43 = vpop.permute.xlu0 %74 }
  0x90   :  { %v88_v49 = vmul.f32 %v801_v44, %v75_v43 }
  0x91   :  { %v167_v47 = vpop.permute.xlu1 %166 }
  0x92   :  { %v140_v52 = vadd.f32 %v132_v48, %v88_v49  ;;  %v183_v3 = vmul.f32 %v808_v50, %v167_v47 }
  0x93   :  { %v65_v51 = vpop.permute.xlu0 %64 }
  0x94   :  { %v192_v55 = vadd.f32 %v184_v54, %v140_v52  ;;  %v86_v61 = vmul.f32 %v801_v44, %v65_v51  ;;  %v191_v9 = vadd.f32 %v183_v3, %v139_v6  ;;  %v263_v6 = vld [vmem:[%s874_s3 + $0x30] sm:$0xff] }
  0x96   :  { %v107_v53 = vpop.permute.xlu1 %106  ;;  %v138_v4 = vadd.f32 %v130_v0, %v86_v61 }
  0x97   :  { %v60_v56 = vpop.permute.xlu0 %59  ;;  %v129_v21 = vmul.f32 %v804_v46, %v107_v53 }
  0x98   :  { %v190_v8 = vadd.f32 %v182_v2, %v138_v4  ;;  %v85_v22 = vmul.f32 %v801_v44, %v60_v56 }
  0x9a   :  { %v137_v31 = vadd.f32 %v129_v21, %v85_v22 }
  0x9b   :  { %v239_v57 = vpop.permute.xlu1 %238  ;;  %v50_v62 = vpop.permute.xlu0 %49 }
  0x9c   :  { %v248_v58 = vadd.f32 %v239_v57, %v192_v55  ;;  %v83_v23 = vmul.f32 %v801_v44, %v50_v62  ;;  %v126_v55 = vmul.f32 %v804_v46, %v792_v38  ;;  %v258_v38 = vld [vmem:[%s874_s3 + $0x8] sm:$0xff] }
  0x9e   :  { %v256_v59 = vmax.f32 %v248_v58, 0.0 }
  0x9f   :  { %v55_v60 = vpop.permute.xlu1 %54  ;;  %v229_v7 = vpop.permute.xlu0 %228 }
  0xa0   :  { %574 = vmatprep.subr.mxu0 %v256_v59  ;;  %v246_v11 = vadd.f32 %v229_v7, %v190_v8  ;;  %v84_v20 = vmul.f32 %v801_v44, %v55_v60  ;;  %v264_v7 = vld [vmem:[%s874_s3 + $0x38] sm:$0xff]  ;;  %v649_v8 = vmov 0.0  }
  0xa1   :  { %575 = vmatpush3.msra.mxu0 %v256_v59  ;;  %602 = vmatprep.subr.mxu1 %v649_v8 }
  0xa2   :  { %v254_v14 = vmax.f32 %v246_v11, 0.0  ;;  %v136_v26 = vadd.f32 %v128_v19, %v84_v20  ;;  %618 = vmatprep.mubr.msk.f32.mxu1 %vm650_vm1, %v649_v8 }
  0xa3   :  { %v40_v17 = vpop.permute.xlu0 %39 }
  0xa4   :  { %v159_v5 = vpop.permute.xlu1 %158  ;;  %v81_v54 = vmul.f32 %v801_v44, %v40_v17 }
  0xa5   :  { %v181_v27 = vmul.f32 %v808_v50, %v159_v5  ;;  %v262_v5 = vld [vmem:[%s874_s3 + $0x28] sm:$0xff] }
  0xa7   :  { %v219_v29 = vpop.permute.xlu0 %218  ;;  %v189_v35 = vadd.f32 %v181_v27, %v137_v31 }
  0xa9   :  { %v234_v10 = vpop.permute.xlu1 %233 }
  0xaa   :  { %v247_v12 = vadd.f32 %v234_v10, %v191_v9 }
  0xab   :  { %v214_v42 = vpop.permute.xlu0 %213 }
  0xac   :  { %v255_v13 = vmax.f32 %v247_v12, 0.0 }
  0xae   :  { %v99_v15 = vpop.permute.xlu1 %98  ;;  %576 = vmatprep.subr.mxu0 %v255_v13 }
  0xaf   :  { %577 = vmatpush3.msra.mxu0 %v255_v13  ;;  %v127_v24 = vmul.f32 %v804_v46, %v99_v15  ;;  %v204_v63 = vpop.permute.xlu0 %203 }
  0xb0   :  { %578 = vmatprep.subr.mxu0 %v254_v14 }
  0xb1   :  { %579 = vmatpush3.msra.mxu0 %v254_v14  ;;  %v135_v32 = vadd.f32 %v127_v24, %v83_v23 }
  0xb3   :  { %v155_v16 = vpop.permute.xlu1 %154  ;;  %v306_v13 = vpop.permute.xlu0 %305 }
  0xb4   :  { %v180_v25 = vmul.f32 %v808_v50, %v155_v16 }
  0xb6   :  { %v188_v33 = vadd.f32 %v180_v25, %v136_v26 }
  0xb8   :  { %v45_v18 = vpop.permute.xlu1 %44  ;;  %v244_v41 = vadd.f32 %v219_v29, %v188_v33 }
  0xb9   :  { %v82_v53 = vmul.f32 %v801_v44, %v45_v18  ;;  %v259_v44 = vld [vmem:[%s874_s3 + $0x10] sm:$0xff]  ;;  %v296_v18 = vpop.permute.xlu0 %295 }
  0xba   :  { %v252_v48 = vmax.f32 %v244_v41, 0.0 }
  0xbb   :  { %v134_v60 = vadd.f32 %v126_v55, %v82_v53 }
  0xbd   :  { %v151_v28 = vpop.permute.xlu1 %150 }
  0xbe   :  { %v179_v30 = vmul.f32 %v808_v50, %v151_v28  ;;  %v286_v28 = vpop.permute.xlu0 %285 }
  0xc0   :  { %v187_v34 = vadd.f32 %v179_v30, %v135_v32 }
  0xc2   :  { %v224_v36 = vpop.permute.xlu1 %223  ;;  %v243_v45 = vadd.f32 %v214_v42, %v187_v34 }
  0xc3   :  { %v245_v40 = vadd.f32 %v224_v36, %v189_v35  ;;  %v276_v36 = vpop.permute.xlu0 %275 }
  0xc4   :  { %v251_v49 = vmax.f32 %v243_v45, 0.0  ;;  %v451_v45 = vld [vmem:[%s876_s5] sm:$0x1] }
  0xc5   :  { %v253_v43 = vmax.f32 %v245_v40, 0.0 }
  0xc7   :  { %v91_v47 = vpop.permute.xlu1 %90  ;;  %580 = vmatprep.subr.mxu0 %v253_v43 }
  0xc8   :  { %581 = vmatpush3.msra.mxu0 %v253_v43  ;;  %v125_v52 = vmul.f32 %v804_v46, %v91_v47  ;;  %v260_v46 = vld [vmem:[%s874_s3 + $0x18] sm:$0xff] }
  0xc9   :  { %582 = vmatprep.subr.mxu0 %v252_v48 }
  0xca   :  { %583 = vmatpush3.msra.mxu0 %v252_v48  ;;  %v133_v58 = vadd.f32 %v125_v52, %v81_v54 }
  0xcb   :  { %584 = vmatprep.subr.mxu0 %v251_v49 }
  0xcc   :  { %v147_v51 = vpop.permute.xlu1 %146  ;;  %585 = vmatpush3.msra.mxu0 %v251_v49 }
  0xcd   :  { %v178_v56 = vmul.f32 %v808_v50, %v147_v51 }
  0xcf   :  { %v186_v62 = vadd.f32 %v178_v56, %v134_v60 }
  0xd0   :  { %v143_v57 = vpop.permute.xlu1 %142 }
  0xd1   :  { %v177_v59 = vmul.f32 %v808_v50, %v143_v57  ;;  %v261_v50 = vld [vmem:[%s874_s3 + $0x20] sm:$0xff] }
  0xd3   :  { %v185_v61 = vadd.f32 %v177_v59, %v133_v58 }
  0xd5   :  { %v209_v0 = vpop.permute.xlu1 %208  ;;  %v241_v2 = vadd.f32 %v204_v63, %v185_v61 }
  0xd6   :  { %v242_v1 = vadd.f32 %v209_v0, %v186_v62 }
  0xd7   :  { %v249_v4 = vmax.f32 %v241_v2, 0.0 }
  0xd8   :  { %v250_v3 = vmax.f32 %v242_v1, 0.0 }
  0xd9   :  { %v311_v11 = vpop.permute.xlu1 %310 }
  0xda   :  { %586 = vmatprep.subr.mxu0 %v250_v3 }
  0xdb   :  { %587 = vmatpush3.msra.mxu0 %v250_v3 }
  0xdc   :  { %588 = vmatprep.subr.mxu0 %v249_v4 }
  0xdd   :  { %589 = vmatpush3.msra.mxu0 %v249_v4  ;;  %v301_v16 = vpop.permute.xlu1 %300 }
  0xde   :  { %591 = vmatmul.mubr.msk.f32.vlgmr.msra.gmra.mxu0 %vm313_vm0, %v258_v38 }
  0xdf   :  { %593 = vmatprep.mubr.msk.f32.mxu0 %vm313_vm0, %v259_v44 }
  0xe1   :  { %v291_v25 = vpop.permute.xlu1 %290 }
  0xe2   :  { %594 = vmatmul.mubr.msk.f32.gmra.mxu0 %vm313_vm0, %v260_v46 }
  0xe3   :  { %596 = vmatprep.mubr.msk.f32.mxu0 %vm313_vm0, %v261_v50 }
  0xe5   :  { %v281_v33 = vpop.permute.xlu1 %280 }
  0xe6   :  { %597 = vmatmul.mubr.msk.f32.gmra.mxu0 %vm313_vm0, %v262_v5 }
  0xe7   :  { %599 = vmatprep.mubr.msk.f32.mxu0 %vm313_vm0, %v263_v6 }
  0xe9   :  { %v456_v47 = vpop.permute.xlu1 %455 }
  0xea   :  { %600 = vmatmul.mubr.msk.f32.gmra.mxu0 %vm313_vm0, %v264_v7  ;;  %v461_v48 = vrot.slane %v456_v47, %v79_v39 }
 0x19e   :  { %v592_v9 = vpop.f32.mrf.mxu0 }
 0x19f   :  { %v410_v34 = vadd.f32 %v592_v9, %v281_v33 }
 0x1a0   :  { %v404_v10 = vpop.f32.mrf.mxu0 }
 0x1a1   :  { %v405_v40 = vadd.f32 %v404_v10, %v276_v36  ;;  %v444_v42 = vmax.f32 %v410_v34, 0.0 }
 0x1a2   :  { %v595_v12 = vpop.f32.mrf.mxu0 }
 0x1a3   :  { %v420_v29 = vadd.f32 %v595_v12, %v291_v25  ;;  %v443_v43 = vmax.f32 %v405_v40, 0.0 }
 0x1a4   :  { %v414_v14 = vpop.f32.mrf.mxu0 }
 0x1a5   :  { %v415_v31 = vadd.f32 %v414_v14, %v286_v28  ;;  %v446_v35 = vmax.f32 %v420_v29, 0.0 }
 0x1a6   :  { %v598_v15 = vpop.f32.mrf.mxu0 }
 0x1a7   :  { %v430_v22 = vadd.f32 %v598_v15, %v301_v16  ;;  %v445_v41 = vmax.f32 %v415_v31, 0.0 }
 0x1a8   :  { %v424_v17 = vpop.f32.mrf.mxu0 }
 0x1a9   :  { %v425_v26 = vadd.f32 %v424_v17, %v296_v18  ;;  %v448_v30 = vmax.f32 %v430_v22, 0.0 }
 0x1aa   :  { %v601_v19 = vpop.f32.mrf.mxu0 }
 0x1ab   :  { %v440_v20 = vadd.f32 %v601_v19, %v311_v11  ;;  %v447_v32 = vmax.f32 %v425_v26, 0.0 }
 0x1ac   :  { %v434_v21 = vpop.f32.mrf.mxu0 }
 0x1ad   :  { %v450_v23 = vmax.f32 %v440_v20, 0.0  ;;  %v435_v24 = vadd.f32 %v434_v21, %v306_v13 }
 0x1af   :  { %v449_v27 = vmax.f32 %v435_v24, 0.0  ;;  %603 = vmatpush3.msra.mxu1 %v450_v23 }
 0x1b0   :  { %604 = vmatprep.subr.mxu1 %v649_v8 }
 0x1b1   :  { %605 = vmatpush3.msra.mxu1 %v449_v27 }
 0x1b2   :  { %606 = vmatprep.subr.mxu1 %v649_v8 }
 0x1b3   :  { %607 = vmatpush3.msra.mxu1 %v448_v30 }
 0x1b4   :  { %608 = vmatprep.subr.mxu1 %v649_v8 }
 0x1b5   :  { %609 = vmatpush3.msra.mxu1 %v447_v32 }
 0x1b6   :  { %610 = vmatprep.subr.mxu1 %v649_v8 }
 0x1b7   :  { %611 = vmatpush3.msra.mxu1 %v446_v35 }
 0x1b8   :  { %612 = vmatprep.subr.mxu1 %v649_v8 }
 0x1b9   :  { %613 = vmatpush3.msra.mxu1 %v445_v41 }
 0x1ba   :  { %614 = vmatprep.subr.mxu1 %v649_v8 }
 0x1bb   :  { %615 = vmatpush3.msra.mxu1 %v444_v42 }
 0x1bc   :  { %616 = vmatprep.subr.mxu1 %v649_v8 }
 0x1bd   :  { %617 = vmatpush3.msra.mxu1 %v443_v43 }
 0x1be   :  { %619 = vmatmul.mubr.msk.f32.vlgmr.msra.gmra.mxu1 %vm313_vm0, %v451_v45 }
 0x27e   :  { %v531_v49 = vpop.f32.mrf.mxu1 }
 0x27f   :  { %v532_v51 = vadd.f32 %v531_v49, %v461_v48 }
 0x280   :  { %v620_v52 = vpop.f32.mrf.mxu1 }
 0x281   :  { %535 = vst [vmem:[%s877_s7] sm:$0x1] %v532_v51 }

</bundles_post_ra>
